<compile_context>
chip_gen: v6e
topology: v6e:2x2x1
jax: 0.10.0
libtpu: 0.0.40
codegen_flags: <defaults>
</compile_context>

<pallas_src>
import functools

import jax
import jax.numpy as jnp
from jax.experimental import pallas as pl
from jax.experimental.pallas import tpu as pltpu

H1, H2 = 256, 128          # hidden sizes of fc1 / fc2 (fixed by the module)


def actor_critic_kernel(s_ref, w1_ref, b1_ref, w2_ref, b2_ref,
                        wh_ref, bh_ref, out_ref, *, action_dim):
    # fc1 + relu : bf16 MXU operands, f32 accumulation
    x = s_ref[...].astype(jnp.bfloat16)                                   # [TB, S]
    h1 = jnp.dot(x, w1_ref[...], preferred_element_type=jnp.float32) + b1_ref[...]
    h1 = jnp.maximum(h1, 0.0).astype(jnp.bfloat16)                        # [TB, 256]

    # fc2 + relu
    h2 = jnp.dot(h1, w2_ref[...], preferred_element_type=jnp.float32) + b2_ref[...]
    h2 = jnp.maximum(h2, 0.0).astype(jnp.bfloat16)                        # [TB, 128]

    # fused actor+critic head: lanes [0:A] = actor logits, lane A = critic value
    head = jnp.dot(h2, wh_ref[...], preferred_element_type=jnp.float32) + bh_ref[...]

    lane = jax.lax.broadcasted_iota(jnp.int32, head.shape, dimension=1)
    is_actor = lane < action_dim

    # masked softmax over actor lanes only, kept in f32 (padded lanes -> exp == 0)
    logits = jnp.where(is_actor, head, -1e30)
    m = jnp.max(logits, axis=-1, keepdims=True)
    e = jnp.exp(logits - m)
    denom = jnp.sum(e, axis=-1, keepdims=True)
    probs = e * pl.reciprocal(denom, approx=True)                         # EUP slot

    # lane-dense slab: probs | value | zeros. probs is already 0 on non-actor
    # lanes, so a single select suffices. Store as bf16 (halved writeback).
    out_ref[...] = jnp.where(lane == action_dim, head, probs).astype(out_ref.dtype)


def init_params(key, state_dim, action_dim):
    """Deterministic f32 init. Weights stored as [in, out] (already transposed)."""
    ks = jax.random.split(key, 8)

    def lin(kw, kb, fan_in, fan_out):
        # Mimic PyTorch default uniform(-1/sqrt(fan_in), 1/sqrt(fan_in))
        bound = 1.0 / jnp.sqrt(jnp.float32(fan_in))
        w = jax.random.uniform(kw, (fan_in, fan_out), jnp.float32, -bound, bound)
        b = jax.random.uniform(kb, (1, fan_out), jnp.float32, -bound, bound)
        return w, b

    w1, b1 = lin(ks[0], ks[1], state_dim, H1)
    w2, b2 = lin(ks[2], ks[3], H1, H2)
    wa, ba = lin(ks[4], ks[5], H2, action_dim)
    wc, bc = lin(ks[6], ks[7], H2, 1)
    return {"w1": w1, "b1": b1, "w2": w2, "b2": b2,
            "wa": wa, "ba": ba, "wc": wc, "bc": bc}


def fuse_params(p):
    """Build kernel-ready params ONCE (hoisted out of the forward wrapper)."""
    A = p["wa"].shape[1]
    P = max(128, ((A + 1 + 127) // 128) * 128)   # actor lanes + critic lane, lane-padded

    wh = jnp.zeros((H2, P), jnp.float32)
    wh = wh.at[:, :A].set(p["wa"]).at[:, A:A + 1].set(p["wc"])
    bh = jnp.zeros((1, P), jnp.float32)
    bh = bh.at[:, :A].set(p["ba"]).at[:, A:A + 1].set(p["bc"])

    return {
        "w1": p["w1"].astype(jnp.bfloat16), "b1": p["b1"],
        "w2": p["w2"].astype(jnp.bfloat16), "b2": p["b2"],
        "wh": wh.astype(jnp.bfloat16), "bh": bh,
        "action_dim": A, "head_pad": P,
    }


def actor_critic_forward(state, kp, *, tile_b=None):
    """Returns (action_probs [B, A] f32, value [B, 1] f32)."""
    B, S = state.shape
    A = kp["action_dim"]
    P = kp["head_pad"]

    if tile_b is None:
        if B <= 16:
            tile_b = B
        else:
            # big tiles (fewer grid steps), but at least 2 steps so both v7x
            # TensorCores get work under dimension_semantics=("parallel",)
            half = ((pl.cdiv(B, 2) + 7) // 8) * 8
            tile_b = min(B, 2048, half)
    grid = (pl.cdiv(B, tile_b),)

    def w_spec(shape):
        # weights/biases: full block, same block index every grid step -> VMEM-resident
        return pl.BlockSpec(shape, lambda i: (0, 0))

    flops = 2 * B * (S * H1 + H1 * H2 + H2 * P)
    bytes_accessed = (4 * B * S                                 # f32 state in
                      + 2 * (S * H1 + H1 * H2 + H2 * P)         # bf16 weights
                      + 4 * (H1 + H2 + P)                       # f32 biases
                      + 2 * B * P)                              # bf16 slab out

    out = pl.pallas_call(
        functools.partial(actor_critic_kernel, action_dim=A),
        out_shape=jax.ShapeDtypeStruct((B, P), jnp.bfloat16),
        grid=grid,
        in_specs=[
            pl.BlockSpec((tile_b, S), lambda i: (i, 0)),   # state tile
            w_spec((S, H1)), w_spec((1, H1)),              # fc1 (bf16 w, f32 b)
            w_spec((H1, H2)), w_spec((1, H2)),             # fc2
            w_spec((H2, P)), w_spec((1, P)),               # fused head
        ],
        out_specs=pl.BlockSpec((tile_b, P), lambda i: (i, 0)),
        compiler_params=pltpu.CompilerParams(
            dimension_semantics=("parallel",)),            # megacore on v7x
        cost_estimate=pl.CostEstimate(
            flops=flops, transcendentals=B * P, bytes_accessed=bytes_accessed),
    )(state, kp["w1"], kp["b1"], kp["w2"], kp["b2"], kp["wh"], kp["bh"])

    # Wrapper-side slicing of the lane-dense slab (free layout plumbing).
    probs = out[:, :A].astype(jnp.float32)
    value = out[:, A:A + 1].astype(jnp.float32)
    return probs, value


def reference_forward(state, p):
    h1 = jnp.maximum(state @ p["w1"] + p["b1"], 0.0)
    h2 = jnp.maximum(h1 @ p["w2"] + p["b2"], 0.0)
    logits = h2 @ p["wa"] + p["ba"]
    probs = jax.nn.softmax(logits, axis=-1)
    value = h2 @ p["wc"] + p["bc"]
    return probs, value


if __name__ == "__main__":
    B, STATE_DIM, ACTION_DIM = 8, 16, 6

    key = jax.random.PRNGKey(0)
    k_state, k_params = jax.random.split(key)

    state = jax.random.normal(k_state, (B, STATE_DIM), jnp.float32)
    params = init_params(k_params, STATE_DIM, ACTION_DIM)
    kparams = fuse_params(params)          # built once, reused every forward call

    probs, value = actor_critic_forward(state, kparams)
    jax.block_until_ready((probs, value))

    # correctness check against plain-JAX f32 reference
    # (bf16 MXU operands + approx reciprocal + bf16 output slab -> ~1e-2 tolerance)
    ref_probs, ref_value = reference_forward(state, params)
    assert probs.shape == (B, ACTION_DIM) and value.shape == (B, 1)
    assert jnp.allclose(probs, ref_probs, atol=2e-2, rtol=2e-2)
    assert jnp.allclose(value, ref_value, atol=5e-2, rtol=5e-2)
    assert jnp.allclose(jnp.sum(probs, axis=-1), 1.0, atol=1e-2)

    # exercise the multi-step batch grid path (grid >= 2 -> both v7x TCs busy)
    B2 = 256
    state2 = jax.random.normal(jax.random.PRNGKey(1), (B2, STATE_DIM), jnp.float32)
    probs2, value2 = actor_critic_forward(state2, kparams)
    jax.block_until_ready((probs2, value2))
    ref_probs2, ref_value2 = reference_forward(state2, params)
    assert jnp.allclose(probs2, ref_probs2, atol=2e-2, rtol=2e-2)
    assert jnp.allclose(value2, ref_value2, atol=5e-2, rtol=5e-2)

    print("KERNEL_OK")
</pallas_src>

<mosaic_0001>
module attributes {stable_mosaic.version = 11 : i64} {
  func.func @actor_critic_kernel(%arg0: i32, %arg1: memref<8x16xf32, #tpu.memory_space<vmem>>, %arg2: memref<16x256xbf16, #tpu.memory_space<vmem>>, %arg3: memref<1x256xf32, #tpu.memory_space<vmem>>, %arg4: memref<256x128xbf16, #tpu.memory_space<vmem>>, %arg5: memref<1x128xf32, #tpu.memory_space<vmem>>, %arg6: memref<128x128xbf16, #tpu.memory_space<vmem>>, %arg7: memref<1x128xf32, #tpu.memory_space<vmem>>, %arg8: memref<8x128xbf16, #tpu.memory_space<vmem>>) attributes {dimension_semantics = [#tpu.dimension_semantics<parallel>], iteration_bounds = array<i64: 1>, scalar_prefetch = 0 : i64, scratch_operands = 0 : i64, tpu.core_type = #tpu.core_type<tc>, window_params = [{transform_indices = @transform_0, window_bounds = array<i64: 8, 16>}, {pipeline_mode = #tpu.pipeline_mode<synchronous>, transform_indices = @transform_1, window_bounds = array<i64: 16, 256>}, {pipeline_mode = #tpu.pipeline_mode<synchronous>, transform_indices = @transform_2, window_bounds = array<i64: 1, 256>}, {pipeline_mode = #tpu.pipeline_mode<synchronous>, transform_indices = @transform_3, window_bounds = array<i64: 256, 128>}, {pipeline_mode = #tpu.pipeline_mode<synchronous>, transform_indices = @transform_4, window_bounds = array<i64: 1, 128>}, {pipeline_mode = #tpu.pipeline_mode<synchronous>, transform_indices = @transform_5, window_bounds = array<i64: 128, 128>}, {pipeline_mode = #tpu.pipeline_mode<synchronous>, transform_indices = @transform_6, window_bounds = array<i64: 1, 128>}, {transform_indices = @transform_7, window_bounds = array<i64: 8, 128>}]} {
    %c0 = arith.constant 0 : index
    %c0_0 = arith.constant 0 : index
    %0 = vector.load %arg1[%c0, %c0_0] : memref<8x16xf32, #tpu.memory_space<vmem>>, vector<8x16xf32>
    %1 = arith.truncf %0 : vector<8x16xf32> to vector<8x16xbf16>
    %c0_1 = arith.constant 0 : index
    %c0_2 = arith.constant 0 : index
    %2 = vector.load %arg2[%c0_1, %c0_2] : memref<16x256xbf16, #tpu.memory_space<vmem>>, vector<16x256xbf16>
    %cst = arith.constant dense<0.000000e+00> : vector<8x256xf32>
    %3 = tpu.matmul %1, %2, %cst {dimension_numbers = #tpu.dot_dimension_numbers<[1], [0], [0], [1], [0, 0, 1, 1], [], []>} : vector<8x16xbf16>, vector<16x256xbf16>, vector<8x256xf32> -> vector<8x256xf32>
    %c0_3 = arith.constant 0 : index
    %c0_4 = arith.constant 0 : index
    %4 = vector.load %arg3[%c0_3, %c0_4] : memref<1x256xf32, #tpu.memory_space<vmem>>, vector<1x256xf32>
    %5 = vector.broadcast %4 : vector<1x256xf32> to vector<8x256xf32>
    %6 = arith.addf %3, %5 : vector<8x256xf32>
    %cst_5 = arith.constant 0.000000e+00 : f32
    %7 = vector.broadcast %cst_5 : f32 to vector<8x256xf32>
    %8 = arith.maximumf %6, %7 : vector<8x256xf32>
    %9 = arith.truncf %8 : vector<8x256xf32> to vector<8x256xbf16>
    %c0_6 = arith.constant 0 : index
    %c0_7 = arith.constant 0 : index
    %10 = vector.load %arg4[%c0_6, %c0_7] : memref<256x128xbf16, #tpu.memory_space<vmem>>, vector<256x128xbf16>
    %cst_8 = arith.constant dense<0.000000e+00> : vector<8x128xf32>
    %11 = tpu.matmul %9, %10, %cst_8 {dimension_numbers = #tpu.dot_dimension_numbers<[1], [0], [0], [1], [0, 0, 1, 1], [], []>} : vector<8x256xbf16>, vector<256x128xbf16>, vector<8x128xf32> -> vector<8x128xf32>
    %c0_9 = arith.constant 0 : index
    %c0_10 = arith.constant 0 : index
    %12 = vector.load %arg5[%c0_9, %c0_10] : memref<1x128xf32, #tpu.memory_space<vmem>>, vector<1x128xf32>
    %13 = vector.broadcast %12 : vector<1x128xf32> to vector<8x128xf32>
    %14 = arith.addf %11, %13 : vector<8x128xf32>
    %cst_11 = arith.constant 0.000000e+00 : f32
    %15 = vector.broadcast %cst_11 : f32 to vector<8x128xf32>
    %16 = arith.maximumf %14, %15 : vector<8x128xf32>
    %17 = arith.truncf %16 : vector<8x128xf32> to vector<8x128xbf16>
    %c0_12 = arith.constant 0 : index
    %c0_13 = arith.constant 0 : index
    %18 = vector.load %arg6[%c0_12, %c0_13] : memref<128x128xbf16, #tpu.memory_space<vmem>>, vector<128x128xbf16>
    %cst_14 = arith.constant dense<0.000000e+00> : vector<8x128xf32>
    %19 = tpu.matmul %17, %18, %cst_14 {dimension_numbers = #tpu.dot_dimension_numbers<[1], [0], [0], [1], [0, 0, 1, 1], [], []>} : vector<8x128xbf16>, vector<128x128xbf16>, vector<8x128xf32> -> vector<8x128xf32>
    %c0_15 = arith.constant 0 : index
    %c0_16 = arith.constant 0 : index
    %20 = vector.load %arg7[%c0_15, %c0_16] : memref<1x128xf32, #tpu.memory_space<vmem>>, vector<1x128xf32>
    %21 = vector.broadcast %20 : vector<1x128xf32> to vector<8x128xf32>
    %22 = arith.addf %19, %21 : vector<8x128xf32>
    %23 = tpu.iota {dimensions = array<i32: 1>} : vector<8x128xi32>
    %c6_i32 = arith.constant 6 : i32
    %24 = vector.broadcast %c6_i32 : i32 to vector<8x128xi32>
    %25 = arith.cmpi slt, %23, %24 : vector<8x128xi32>
    %cst_17 = arith.constant -1.000000e+30 : f32
    %26 = vector.broadcast %cst_17 : f32 to vector<8x128xf32>
    %27 = arith.select %25, %22, %26 : vector<8x128xi1>, vector<8x128xf32>
    %cst_18 = arith.constant dense<0xFF800000> : vector<8xf32>
    %28 = vector.multi_reduction <maximumf>, %27, %cst_18 [1] : vector<8x128xf32> to vector<8xf32>
    %29 = vector.shape_cast %28 : vector<8xf32> to vector<8x1xf32>
    %30 = vector.broadcast %29 : vector<8x1xf32> to vector<8x128xf32>
    %31 = arith.subf %27, %30 : vector<8x128xf32>
    %32 = math.exp %31 : vector<8x128xf32>
    %cst_19 = arith.constant dense<0.000000e+00> : vector<8xf32>
    %33 = vector.multi_reduction <add>, %32, %cst_19 [1] : vector<8x128xf32> to vector<8xf32>
    %34 = vector.shape_cast %33 : vector<8xf32> to vector<8x1xf32>
    %35 = tpu.reciprocal %34 {approx = true} : vector<8x1xf32> -> vector<8x1xf32>
    %36 = vector.broadcast %35 : vector<8x1xf32> to vector<8x128xf32>
    %37 = arith.mulf %32, %36 : vector<8x128xf32>
    %c6_i32_20 = arith.constant 6 : i32
    %38 = vector.broadcast %c6_i32_20 : i32 to vector<8x128xi32>
    %39 = arith.cmpi eq, %23, %38 : vector<8x128xi32>
    %40 = arith.select %39, %22, %37 : vector<8x128xi1>, vector<8x128xf32>
    %41 = arith.truncf %40 : vector<8x128xf32> to vector<8x128xbf16>
    %c0_21 = arith.constant 0 : index
    %c0_22 = arith.constant 0 : index
    %42 = vector.load %arg8[%c0_21, %c0_22] : memref<8x128xbf16, #tpu.memory_space<vmem>>, vector<8x128xbf16>
    tpu.vector_store %arg8[%c0_21, %c0_22], %41 {strides = array<i32>} : memref<8x128xbf16, #tpu.memory_space<vmem>>, vector<8x128xbf16>,
    return
  }
  func.func @transform_0(%arg0: i32) -> (i32, i32) {
    %c0_i32 = arith.constant 0 : i32
    %c0_i32_0 = arith.constant 0 : i32
    return %arg0, %c0_i32 : i32, i32
  }
  func.func @transform_1(%arg0: i32) -> (i32, i32) {
    %c0_i32 = arith.constant 0 : i32
    %c0_i32_0 = arith.constant 0 : i32
    %c0_i32_1 = arith.constant 0 : i32
    return %c0_i32, %c0_i32_0 : i32, i32
  }
  func.func @transform_2(%arg0: i32) -> (i32, i32) {
    %c0_i32 = arith.constant 0 : i32
    %c0_i32_0 = arith.constant 0 : i32
    %c0_i32_1 = arith.constant 0 : i32
    return %c0_i32, %c0_i32_0 : i32, i32
  }
  func.func @transform_3(%arg0: i32) -> (i32, i32) {
    %c0_i32 = arith.constant 0 : i32
    %c0_i32_0 = arith.constant 0 : i32
    %c0_i32_1 = arith.constant 0 : i32
    return %c0_i32, %c0_i32_0 : i32, i32
  }
  func.func @transform_4(%arg0: i32) -> (i32, i32) {
    %c0_i32 = arith.constant 0 : i32
    %c0_i32_0 = arith.constant 0 : i32
    %c0_i32_1 = arith.constant 0 : i32
    return %c0_i32, %c0_i32_0 : i32, i32
  }
  func.func @transform_5(%arg0: i32) -> (i32, i32) {
    %c0_i32 = arith.constant 0 : i32
    %c0_i32_0 = arith.constant 0 : i32
    %c0_i32_1 = arith.constant 0 : i32
    return %c0_i32, %c0_i32_0 : i32, i32
  }
  func.func @transform_6(%arg0: i32) -> (i32, i32) {
    %c0_i32 = arith.constant 0 : i32
    %c0_i32_0 = arith.constant 0 : i32
    %c0_i32_1 = arith.constant 0 : i32
    return %c0_i32, %c0_i32_0 : i32, i32
  }
  func.func @transform_7(%arg0: i32) -> (i32, i32) {
    %c0_i32 = arith.constant 0 : i32
    %c0_i32_0 = arith.constant 0 : i32
    return %arg0, %c0_i32 : i32, i32
  }
}

</mosaic_0001>

<bundles_post_ra>
// kernel: tpu_custom_call.1
= control target key start
LH: loop header
LB: loop body
LE: loop exit
PB: predicated region body
PF: predicated region fallthrough
CT: control target
= control target key end

     0   :  { %12 = vsyncpa [#allocation3], 0  ;;  %s785_s0 = inlined_call_operand.hbm [shape: f32[8,16], index: 0, kind: input, shape index: {}]   ;;  %s786_s1 = inlined_call_operand.hbm [shape: bf16[16,256], index: 1, kind: input, shape index: {}]   ;;  %s787_s2 = inlined_call_operand.vmem [shape: f32[1,256], index: 2, kind: input, shape index: {}]   ;;  %s788_s3 = inlined_call_operand.hbm [shape: bf16[256,128], index: 3, kind: input, shape index: {}]   ;;  %s789_s4 = inlined_call_operand.vmem [shape: f32[1,128], index: 4, kind: input, shape index: {}]   ;;  %s790_s5 = inlined_call_operand.hbm [shape: bf16[128,128], index: 5, kind: input, shape index: {}]   ;;  %s791_s6 = inlined_call_operand.vmem [shape: f32[1,128], index: 6, kind: input, shape index: {}]   ;;  %s792_s7 = inlined_call_operand.hbm [shape: bf16[8,128], index: 7, kind: output, shape index: {}]  }
   0x1   :  { %13 = vsyncpa [#allocation6], 0 }
   0x2   :  { %14 = vsyncpa [#allocation9], 0 }
   0x3   :  { %15 = vsyncpa [#allocation4], 0  ;;  %s709_s24 = smov [#allocation5]  }
   0x4   :  { %s31_s25 = sshll.u32 %s709_s24, 4  ;;  %s32_s25 = int_to_ptr.vmem [resolvable:$true] %s31_s25 }
   0x5   :  { %s609_s26 = scalar_lea.vmem %s32_s25, 256  ;;  %p614_p1 = scmp.lt.s32.totalorder %s32_s25, %s32_s25 }
   0x6   :  { %p610_p0 = scmp.ne.s32.totalorder %s32_s25, %s609_s26  ;;  %p615_p2 = scmp.lt.s32.totalorder %s609_s26, %s609_s26 }
   0x8   :  { %p616_p3 = por %p615_p2, %p614_p1 }
   0xa   :  { %p617_p4 = pnand %p616_p3, %p610_p0 }
   0xc   :  { %620 = shalt.err (!%p617_p4)
}
   0xd   :  { %s710_s27 = smov 128   ;;  %s711_s28 = smov 8  }
   0xe   :  { %37 = dma.hbm_to_vmem [thread:$0]  %s786_s1, 256, %s32_s25, [#allocation6], %s710_s27, %s710_s27, %s711_s28  }
   0xf   :  { %s712_s8 = smov [#allocation2]   ;;  %s713_s10 = smov [#allocation7]  }
  0x10   :  { %s22_s9 = sshll.u32 %s712_s8, 4  ;;  %s45_s11 = sshll.u32 %s713_s10, 4  ;;  %s23_s9 = int_to_ptr.vmem [resolvable:$true] %s22_s9  ;;  %s46_s11 = int_to_ptr.vmem [resolvable:$true] %s45_s11 }
  0x11   :  { %s629_s12 = scalar_lea.vmem %s23_s9, 128  ;;  %p634_p6 = scmp.lt.s32.totalorder %s23_s9, %s23_s9 }
  0x12   :  { %p630_p5 = scmp.ne.s32.totalorder %s23_s9, %s629_s12  ;;  %p635_p7 = scmp.lt.s32.totalorder %s629_s12, %s629_s12 }
  0x14   :  { %p636_p8 = por %p635_p7, %p634_p6 }
  0x16   :  { %p637_p9 = pnand %p636_p8, %p630_p5 }
  0x18   :  { %640 = shalt.err (!%p637_p9)
}
  0x19   :  { %25 = dma.hbm_to_vmem [thread:$0]  %s785_s0, 128, %s23_s9, [#allocation3]  }
  0x1a   :  { %s649_s15 = scalar_lea.vmem %s46_s11, 2048  ;;  %p654_p11 = scmp.lt.s32.totalorder %s46_s11, %s46_s11 }
  0x1b   :  { %p650_p10 = scmp.ne.s32.totalorder %s46_s11, %s649_s15  ;;  %p655_p12 = scmp.lt.s32.totalorder %s649_s15, %s649_s15 }
  0x1d   :  { %p656_p13 = por %p655_p12, %p654_p11 }
  0x1f   :  { %p657_p0 = pnand %p656_p13, %p650_p10 }
  0x21   :  { %660 = shalt.err (!%p657_p0)
}
  0x22   :  { %s714_s1 = smov 64   ;;  %s715_s16 = smov 4  }
  0x23   :  { %51 = dma.hbm_to_vmem [thread:$0]  %s788_s3, 2048, %s46_s11, [#allocation6], %s714_s1, %s714_s1, %s715_s16  }
  0x24   :  { %s716_s19 = smov [#allocation8]  }
  0x25   :  { %s59_s20 = sshll.u32 %s716_s19, 4  ;;  %s60_s20 = int_to_ptr.vmem [resolvable:$true] %s59_s20 }
  0x26   :  { %s669_s21 = scalar_lea.vmem %s60_s20, 1024  ;;  %p674_p2 = scmp.lt.s32.totalorder %s60_s20, %s60_s20 }
  0x27   :  { %p670_p1 = scmp.ne.s32.totalorder %s60_s20, %s669_s21  ;;  %p675_p3 = scmp.lt.s32.totalorder %s669_s21, %s669_s21 }
  0x29   :  { %p676_p4 = por %p675_p3, %p674_p2 }
  0x2b   :  { %p677_p5 = pnand %p676_p4, %p670_p1 }
  0x2d   :  { %680 = shalt.err (!%p677_p5)
}
  0x2e   :  { %65 = dma.hbm_to_vmem [thread:$0]  %s790_s5, 1024, %s60_s20, [#allocation9], %s714_s1, %s714_s1, %s715_s16  }
  0x2f   :  { %701 = dma.done.wait [#allocation3], 128  }
  0x30   :  { %702 = vsyncadd [#allocation3], 4294967168 }
  0x31   :  { %703 = dma.done.wait [#allocation6], 2304  }
  0x32   :  { %704 = vsyncadd [#allocation6], 4294964992 }
  0x33   :  { %705 = dma.done.wait [#allocation9], 1024  }
  0x34   :  { %706 = vsyncadd [#allocation9], 4294966272  ;;  %v717_v0 = vmov 0   ;;  %v570_v1 = vld [vmem:[#allocation5 + $0x4] ss:$8 sps:$4 sm:$0xff]   ;;  %v81_v3 = vld [vmem:[#allocation2] sm:$0xff]  ;;  %v87_v27 = vlaneseq }
  0x35   :  { %143 = vmatprep.mubr.bf16.mxu0 %v717_v0  ;;  %v572_v2 = vld [vmem:[#allocation5] ss:$8 sps:$4 sm:$0xff]   ;;  %125 = vmatprep.subr.bf16.mxu0 %v570_v1  ;;  %v82_v4 = vpack.c.bf16 %v81_v3, %v81_v3  ;;  %vm107_vm0 = vcmask 130048   ;;  %v577_v9 = vld [vmem:[#allocation7 + $0x68] sm:$0xff]   ;;  %v579_v11 = vld [vmem:[#allocation7 + $0x60] sm:$0xff]   ;;  %v718_v22 = vmov 0.0  }
  0x36   :  { %v573_v5 = vld [vmem:[#allocation7 + $0x78] sm:$0xff]   ;;  %126 = vmatpush1.bf16.msra.mxu0 %v572_v2  ;;  %v575_v7 = vld [vmem:[#allocation7 + $0x70] sm:$0xff]   ;;  %v578_v10 = vld [vmem:[#allocation7 + $0x28] sm:$0xff]   ;;  %v88_v28 = vshrl.u32 %v87_v27, 7  ;;  %vm719_vm1 = vmmov 0   ;;  %v445_v56 = vand.u32 127, %v87_v27 }
  0x37   :  { %v574_v6 = vld [vmem:[#allocation7 + $0x38] sm:$0xff]   ;;  %507 = vmatprep.subr.bf16.mxu1 %v573_v5  ;;  %v576_v8 = vld [vmem:[#allocation7 + $0x30] sm:$0xff]   ;;  %v580_v12 = vld [vmem:[#allocation7 + $0x20] sm:$0xff]   ;;  %538 = vmatprep.subr.bf16.mxu0 %v718_v22 }
  0x38   :  { %508 = vmatpush3.bf16.msra.mxu1 %v574_v6  ;;  %v581_v13 = vld [vmem:[#allocation7 + $0x58] sm:$0xff]   ;;  %v583_v15 = vld [vmem:[#allocation7 + $0x50] sm:$0xff]   ;;  %v585_v17 = vld [vmem:[#allocation7 + $0x48] sm:$0xff]   ;;  %v89_v29 = vsub.s32 0, %v88_v28  ;;  %v93_v31 = vsub.s32 1, %v88_v28  ;;  %vm446_vm2 = vcmp.lt.s32.totalorder %v445_v56, 6 }
  0x39   :  { %480 = vmatmul.mubr.msk.bf16.vlgmr.msra.gmra.mxu0 %vm107_vm0, %v82_v4  ;;  %509 = vmatprep.subr.bf16.mxu1 %v575_v7  ;;  %v582_v14 = vld [vmem:[#allocation7 + $0x18] sm:$0xff]   ;;  %v584_v16 = vld [vmem:[#allocation7 + $0x10] sm:$0xff]   ;;  %v586_v18 = vld [vmem:[#allocation7 + $0x8] sm:$0xff]   ;;  %vm457_vm3 = vcmp.eq.s32.totalorder %v445_v56, 6 }
  0x3a   :  { %v587_v19 = vld [vmem:[#allocation7 + $0x40] sm:$0xff]   ;;  %v589_v21 = vld [vmem:[#allocation8 + $0x38] sm:$0xff]   ;;  %v590_v23 = vld [vmem:[#allocation8 + $0x30] sm:$0xff]   ;;  %554 = vmatprep.mubr.msk.bf16.mxu0 %vm719_vm1, %v718_v22 }
  0x3b   :  { %v588_v20 = vld [vmem:[#allocation7] sm:$0xff]   ;;  %539 = vmatpush3.bf16.msra.mxu0 %v589_v21  ;;  %v591_v24 = vld [vmem:[#allocation8 + $0x28] sm:$0xff]   ;;  %v593_v26 = vld [vmem:[#allocation8 + $0x18] sm:$0xff]  }
  0x3c   :  { %510 = vmatpush3.bf16.msra.mxu1 %v576_v8  ;;  %540 = vmatprep.subr.bf16.mxu0 %v718_v22  ;;  %v592_v25 = vld [vmem:[#allocation8 + $0x20] sm:$0xff]   ;;  %v85_v30 = vld [vmem:[%s787_s2] sm:$0x3]  ;;  %v594_v44 = vld [vmem:[#allocation8 + $0x10] sm:$0xff]  }
  0x3d   :  { %511 = vmatprep.subr.bf16.mxu1 %v577_v9  ;;  %v90_v32 = vrot.slane %v85_v30, %v89_v29  ;;  %v94_v33 = vrot.slane %v85_v30, %v93_v31  ;;  %v595_v45 = vld [vmem:[#allocation8 + $0x8] sm:$0xff]   ;;  %v596_v46 = vld [vmem:[#allocation8] sm:$0xff]  }
  0x3e   :  { %v481_v48 = vld [vmem:[%s789_s4] ss:$0 sm:$0xff]  ;;  %s720_s4 = smov [#allocation10]  }
  0x3f   :  { %541 = vmatpush3.bf16.msra.mxu0 %v590_v23  ;;  %v498_v57 = vld [vmem:[%s791_s6] ss:$0 sm:$0xff]  ;;  %s467_s6 = sshll.u32 %s720_s4, 4  ;;  %s468_s6 = int_to_ptr.vmem [resolvable:$true] %s467_s6 }
  0x40   :  { %512 = vmatpush3.bf16.msra.mxu1 %v578_v10  ;;  %542 = vmatprep.subr.bf16.mxu0 %v718_v22  ;;  %s681_s26 = scalar_lea.vmem %s468_s6, 64  ;;  %p686_p7 = scmp.lt.s32.totalorder %s468_s6, %s468_s6 }
  0x41   :  { %513 = vmatprep.subr.bf16.mxu1 %v579_v11  ;;  %p682_p6 = scmp.ne.s32.totalorder %s468_s6, %s681_s26  ;;  %p687_p8 = scmp.lt.s32.totalorder %s681_s26, %s681_s26 }
  0x43   :  { %543 = vmatpush3.bf16.msra.mxu0 %v591_v24  ;;  %p688_p9 = por %p687_p8, %p686_p7 }
  0x44   :  { %514 = vmatpush3.bf16.msra.mxu1 %v580_v12  ;;  %544 = vmatprep.subr.bf16.mxu0 %v718_v22 }
  0x45   :  { %515 = vmatprep.subr.bf16.mxu1 %v581_v13  ;;  %p689_p10 = pnand %p688_p9, %p682_p6 }
  0x47   :  { %545 = vmatpush3.bf16.msra.mxu0 %v592_v25 }
  0x48   :  { %516 = vmatpush3.bf16.msra.mxu1 %v582_v14  ;;  %546 = vmatprep.subr.bf16.mxu0 %v718_v22 }
  0x49   :  { %517 = vmatprep.subr.bf16.mxu1 %v583_v15 }
  0x4b   :  { %547 = vmatpush3.bf16.msra.mxu0 %v593_v26 }
  0x4c   :  { %518 = vmatpush3.bf16.msra.mxu1 %v584_v16  ;;  %548 = vmatprep.subr.bf16.mxu0 %v718_v22 }
  0x4d   :  { %519 = vmatprep.subr.bf16.mxu1 %v585_v17 }
  0x4f   :  { %549 = vmatpush3.bf16.msra.mxu0 %v594_v44 }
  0x50   :  { %520 = vmatpush3.bf16.msra.mxu1 %v586_v18  ;;  %550 = vmatprep.subr.bf16.mxu0 %v718_v22 }
  0x51   :  { %521 = vmatprep.subr.bf16.mxu1 %v587_v19 }
  0x53   :  { %551 = vmatpush3.bf16.msra.mxu0 %v595_v45 }
  0x54   :  { %522 = vmatpush3.bf16.msra.mxu1 %v588_v20  ;;  %552 = vmatprep.subr.bf16.mxu0 %v718_v22 }
  0x57   :  { %553 = vmatpush3.bf16.msra.mxu0 %v596_v46 }
  0xf9   :  { %v145_v34 = vpop.f32.mrf.mxu0 }
  0xfa   :  { %v146_v35 = vadd.f32 %v145_v34, %v90_v32 }
  0xfb   :  { %v147_v36 = vpop.f32.mrf.mxu0 }
  0xfc   :  { %v148_v37 = vadd.f32 %v147_v36, %v94_v33  ;;  %v152_v38 = vmax.f32 %v146_v35, 0.0 }
  0xfd   :  { %v149_v39 = vpop.f32.mrf.mxu0 }
  0xfe   :  { %v153_v40 = vmax.f32 %v148_v37, 0.0  ;;  %v154_v43 = vpack.c.bf16 %v152_v38, %v152_v38 }
  0xff   :  { %v150_v41 = vpop.f32.mrf.mxu0 }
 0x100   :  { %v155_v42 = vpack.c.bf16 %v153_v40, %v153_v40 }
 0x102   :  { %323 = vmatprep.mubr.bf16.mxu1 %v155_v42 }
 0x103   :  { %324 = vmatmul.mubr.bf16.vlgmr.msra.gmra.mxu1 %v154_v43 }
 0x1c3   :  { %v523_v47 = vpop.f32.mrf.mxu1 }
 0x1c5   :  { %v524_v49 = vpop.f32.mrf.mxu1 }
 0x1c6   :  { %v525_v50 = vadd.f32 %v524_v49, %v523_v47 }
 0x1c7   :  { %v526_v51 = vpop.f32.mrf.mxu1 }
 0x1c8   :  { %v326_v52 = vadd.f32 %v525_v50, %v481_v48 }
 0x1c9   :  { %v527_v53 = vpop.f32.mrf.mxu1 }
 0x1ca   :  { %v331_v54 = vmax.f32 %v326_v52, 0.0 }
 0x1cc   :  { %v332_v55 = vpack.c.bf16 %v331_v54, %v331_v54 }
 0x1ce   :  { %555 = vmatmul.mubr.bf16.vlgmr.msra.gmra.mxu0 %v332_v55 }
 0x28e   :  { %v438_v58 = vpop.f32.mrf.mxu0 }
 0x28f   :  { %v439_v59 = vadd.f32 %v498_v57, %v438_v58 }
 0x290   :  { %v556_v60 = vpop.f32.mrf.mxu0 }
 0x291   :  { %v447_v61 = vsel %vm446_vm2, %v439_v59, -1e+30 }
 0x292   :  { %448 = vmax.xlane.f32.xlu0 %v447_v61  ;;  %v441_v62 = vpop.f32.mrf.mxu0 }
 0x294   :  { %v557_v63 = vpop.f32.mrf.mxu0 }
 0x31b   :  { %v449_v0 = vpop.xlane.xlu0 %448 }
 0x31c   :  { %v450_v1 = vsub.f32 %v447_v61, %v449_v0 }
 0x31e   :  { %v451_v2 = vmul.f32 1.442695, %v450_v1 }
 0x320   :  { %597 = vpow2.f32 %v451_v2 }
 0x32d   :  { %v598_v3 = vpop.eup %597 }
 0x32e   :  { %453 = vadd.xlane.f32.xlu0 %v598_v3 }
 0x3b7   :  { %v454_v4 = vpop.xlane.xlu0 %453 }
 0x3b8   :  { %599 = vrcp.f32 %v454_v4 }
 0x3c5   :  { %v600_v5 = vpop.eup %599 }
 0x3c6   :  { %v456_v6 = vmul.f32 %v600_v5, %v598_v3 }
 0x3c8   :  { %v458_v7 = vsel %vm457_vm3, %v439_v59, %v456_v6 }
 0x3c9   :  { %v459_v8 = vpack.c.bf16 %v458_v7, %v458_v7 }
 0x3cb   :  { %460 = vst [vmem:[#allocation10] sm:$0xf] %v459_v8 }
 0x3cc   :  { %692 = shalt.err (!%p689_p10)
}
 0x3cd   :  { %470 = dma.vmem_to_hbm [thread:$0]  %s468_s6, 64, %s792_s7, [#allocation4]  }
 0x3ce   :  { %707 = dma.done.wait [#allocation4], 64  }
 0x3cf   :  { %708 = vsyncadd [#allocation4], 4294967232 }
 0x3d0   :  { %474 = vsyncpa [#allocation3], 1 }
 0x3d1   :  { %475 = vsyncpa [#allocation6], 1 }
 0x3d2   :  { %476 = vsyncpa [#allocation9], 1 }
 0x3d3   :  { %477 = vsyncpa [#allocation4], 1 }

</bundles_post_ra>
